<compile_context>
chip_gen: v6e
topology: v6e:2x2x1
jax: 0.10.0
libtpu: 0.0.40
codegen_flags: <defaults>
</compile_context>

<pallas_src>
import functools

import numpy as np
import jax
import jax.numpy as jnp
from jax import lax
from jax.experimental import pallas as pl
from jax.experimental.pallas import tpu as pltpu


_LANES = 128          # vreg lane width: output last dim stays lane-dense
_SUBLANES = 8         # sublane granularity for int32 tiles
_TM_TARGET = 1024     # max token rows per grid step: 1024*128*4B = 512 KiB/buffer
_STRIP_TARGET = 32    # rows per register-resident strip (4 int32 vregs)
_MAX_SMEM_VOCAB = 2048  # guard for the SMEM scalar-prefetch vocab table


def _round_up(x, m):
    return -(-x // m) * m


def _word_code(word: str) -> int:
    """Deterministic string -> int32 code (independent of PYTHONHASHSEED)."""
    h = 0
    for ch in word:
        h = (h * 131 + ord(ch)) % (2 ** 31 - 1)
    return int(h)


def _choose_tile_rows(rows):
    """Rows per grid step: <= _TM_TARGET, sublane multiple, and small enough
    that the grid has >= 2 steps whenever `rows` allows it, so both v7x
    TensorCores get work (no-op on single-TC v5e/v6e)."""
    return min(_TM_TARGET, max(_SUBLANES, _round_up(rows // 2, _SUBLANES)))


def _choose_strip_rows(tm):
    """Largest divisor of tm that is <= _STRIP_TARGET and a sublane multiple."""
    for cand in (32, 24, 16, 8):
        if cand <= _STRIP_TARGET and tm % cand == 0:
            return cand
    return tm


def vocab_lookup_kernel(vocab_ref, codes_ref, out_ref, *,
                        vocab_size, ukn_index, strip_rows, unroll):
    """Per-lane vocabulary lookup on a lane-dense token tile.

    vocab_ref: (V,)      int32 vocab codes, SMEM (scalar prefetch)
    codes_ref: (TM, 128) int32 token codes, VMEM
    out_ref  : (TM, 128) int32 vocab indices, VMEM

    Outer loop: register-resident row strips.  Inner loop: vocab scan with
    select-accumulate (vocab codes are unique -> at most one match per token).
    """
    n_strips = codes_ref.shape[0] // strip_rows

    def strip_body(s, carry):
        r0 = pl.multiple_of(s * strip_rows, strip_rows)
        strip = codes_ref[pl.ds(r0, strip_rows), :]            # <= 4 vregs
        acc0 = jnp.full((strip_rows, _LANES), jnp.int32(ukn_index),
                        dtype=jnp.int32)                        # <= 4 vregs

        def vocab_body(v, acc):
            code_v = vocab_ref[v]                               # SMEM scalar read
            # Select-accumulate: pure per-lane VPU compare + select.
            return jnp.where(strip == code_v, v, acc)

        acc = lax.fori_loop(0, vocab_size, vocab_body, acc0, unroll=unroll)
        out_ref[pl.ds(r0, strip_rows), :] = acc
        return carry

    lax.fori_loop(0, n_strips, strip_body, 0)


def pallas_vocab_lookup(codes_rows, vocab_codes, ukn_index, tm):
    """codes_rows: (rows, 128) int32 lane-dense token codes (host pre-padded);
    vocab_codes: (V,) int32; tm: rows per grid step (divides rows).
    Returns (rows, 128) int32 vocab indices."""
    rows, lanes = codes_rows.shape
    assert lanes == _LANES and rows % _SUBLANES == 0 and rows % tm == 0
    v = int(vocab_codes.shape[0])
    if v > _MAX_SMEM_VOCAB:
        # TODO(synk): for large vocabularies (V >~ 2k) the SMEM table and the
        # O(V) per-lane scan stop making sense; stage sorted codes in VMEM and
        # do an O(log V) vectorized binary search, or resolve indices host-side.
        raise NotImplementedError("vocabulary too large for SMEM linear-scan kernel")

    strip_rows = _choose_strip_rows(tm)
    n_tokens = rows * _LANES
    # Small vocab: fully unroll the register-resident inner scan; larger vocab:
    # chunked unroll to keep scalar-slot / code-size pressure bounded.
    unroll = True if v <= 64 else 16

    kernel = functools.partial(vocab_lookup_kernel, vocab_size=v,
                               ukn_index=int(ukn_index),
                               strip_rows=strip_rows, unroll=unroll)
    # VPU-bound (compare + select per token per vocab entry); never touches MXU.
    cost = pl.CostEstimate(flops=2 * n_tokens * v,
                           transcendentals=0,
                           bytes_accessed=4 * (2 * n_tokens + v))

    return pl.pallas_call(
        kernel,
        out_shape=jax.ShapeDtypeStruct((rows, _LANES), jnp.int32),
        grid_spec=pltpu.PrefetchScalarGridSpec(
            num_scalar_prefetch=1,                 # vocab codes -> SMEM
            grid=(rows // tm,),
            in_specs=[pl.BlockSpec((tm, _LANES), lambda i, vocab: (i, 0))],
            out_specs=pl.BlockSpec((tm, _LANES), lambda i, vocab: (i, 0)),
        ),
        compiler_params=pltpu.CompilerParams(
            # Token tiles are independent: shard grid steps across v7x's 2 TCs.
            dimension_semantics=("parallel",),
        ),
        cost_estimate=cost,
    )(vocab_codes, codes_rows)


class WordTokenizerPallas:
    """JAX/Pallas version of WordTokenizer.forward."""

    def __init__(self, vocabulary, is_sos_token=True, bert_pretrain=False):
        self.vocabulary = list(vocabulary)
        self.is_sos_token = is_sos_token
        self.eos_index = self.vocabulary.index('<eos>')
        self.ukn_index = self.vocabulary.index('<ukn>')
        self.bert_pretrain = bert_pretrain
        # TODO(synk): bert_pretrain mask_word() does Python-RNG string masking; no Pallas equivalent.
        codes = [_word_code(w) for w in self.vocabulary]
        # Uniqueness of vocab codes is a HARD correctness requirement for the
        # kernel's select-accumulate (at most one vocab entry may match a token).
        if len(set(codes)) != len(codes):
            raise ValueError("word-code collision inside vocabulary")
        # TODO(synk): hash-code matching is a proxy for string equality; an
        # out-of-vocabulary word colliding with a vocab code would map to that
        # entry instead of <ukn>.
        self.vocab_codes = jnp.array(codes, dtype=jnp.int32)
        self.eos_code = _word_code('<eos>')

    def forward(self, inputs):
        batch_size = len(inputs)
        if self.is_sos_token:
            inputs = ['<sos> {} <eos>'.format(cap) for cap in inputs]
        else:
            inputs = ['{} <eos>'.format(cap) for cap in inputs]
        captions = [cap.strip().split() for cap in inputs]
        caption_lengths = [len(cap) for cap in captions]
        max_len = max(caption_lengths)

        n = batch_size * max_len
        rows_min = _round_up(max(_round_up(n, _LANES) // _LANES, 1), _SUBLANES)
        tm = _choose_tile_rows(rows_min)
        rows = _round_up(rows_min, tm)

        # Host-built, lane-dense, pre-padded code buffer (no device-side
        # reshape/pad).  Caption padding uses the <eos> code so padded slots
        # look up to eos_index, matching pad_sequence(padding_value=eos_index);
        # the trailing alignment pad is sliced away below.
        codes_flat = np.full((rows * _LANES,), self.eos_code, dtype=np.int32)
        for i, cap in enumerate(captions):
            base = i * max_len
            for j, word in enumerate(cap):
                codes_flat[base + j] = _word_code(word)
        codes_rows = jnp.asarray(codes_flat.reshape(rows, _LANES))

        out_rows = pallas_vocab_lookup(codes_rows, self.vocab_codes,
                                       self.ukn_index, tm)
        index_tensor = out_rows.reshape(-1)[:n].reshape(batch_size, max_len)
        # TODO(synk): torch pad_sequence of LongTensors yields int64; we return
        # int32 (JAX default). Cast downstream if int64 indices are required.
        return index_tensor, caption_lengths


def _reference_forward(vocabulary, inputs, is_sos_token):
    """Pure-python re-implementation of the torch forward (int32 instead of int64)."""
    eos_index = vocabulary.index('<eos>')
    ukn_index = vocabulary.index('<ukn>')
    if is_sos_token:
        inputs = ['<sos> {} <eos>'.format(cap) for cap in inputs]
    else:
        inputs = ['{} <eos>'.format(cap) for cap in inputs]
    captions = [cap.strip().split() for cap in inputs]
    idx = [[vocabulary.index(w) if w in vocabulary else ukn_index for w in cap]
           for cap in captions]
    lengths = [len(c) for c in idx]
    max_len = max(lengths)
    out = np.full((len(idx), max_len), eos_index, dtype=np.int32)
    for i, row in enumerate(idx):
        out[i, :len(row)] = row
    return out, lengths


if __name__ == "__main__":
    # Deterministic synthetic vocabulary (stands in for the pickled vocab file).
    base_words = ["a", "man", "is", "playing", "guitar", "the", "dog", "runs",
                  "fast", "on", "grass", "woman", "sings", "song", "cat",
                  "jumps", "over", "fence", "child", "eats", "apple", "red",
                  "ball", "rolls", "down", "hill", "bird", "flies"]
    vocabulary = ['<sos>', '<eos>', '<ukn>', '<mask>'] + base_words  # V = 32

    # Deterministic example inputs: pick words from the vocab with PRNGKey(0),
    # and include one out-of-vocabulary word to exercise the <ukn> path.
    key = jax.random.PRNGKey(0)
    word_ids = jax.random.randint(key, (8,), 4, len(vocabulary))  # skip specials
    picks = [base_words[int(i) - 4] for i in word_ids]
    inputs = [
        " ".join(picks[:4] + ["zebra"]),   # 5 words, "zebra" is OOV -> <ukn>
        " ".join(picks[4:7]),              # 3 words
    ]

    tokenizer = WordTokenizerPallas(vocabulary, is_sos_token=True,
                                    bert_pretrain=False)
    index_tensor, caption_lengths = tokenizer.forward(inputs)
    index_tensor = jax.block_until_ready(index_tensor)

    ref_tensor, ref_lengths = _reference_forward(vocabulary, inputs, True)
    assert index_tensor.shape == ref_tensor.shape, (index_tensor.shape, ref_tensor.shape)
    assert caption_lengths == ref_lengths, (caption_lengths, ref_lengths)
    np.testing.assert_array_equal(np.asarray(index_tensor), ref_tensor)

    print("KERNEL_OK")
</pallas_src>

<mosaic_0001>
module attributes {stable_mosaic.version = 11 : i64} {
  func.func @vocab_lookup_kernel(%arg0: i32, %arg1: memref<32xi32, #tpu.memory_space<smem>>, %arg2: memref<8x128xi32, #tpu.memory_space<vmem>>, %arg3: memref<8x128xi32, #tpu.memory_space<vmem>>) attributes {dimension_semantics = [#tpu.dimension_semantics<parallel>], iteration_bounds = array<i64: 1>, scalar_prefetch = 1 : i64, scratch_operands = 0 : i64, tpu.core_type = #tpu.core_type<tc>, window_params = [{transform_indices = @transform_0, window_bounds = array<i64: 8, 128>}, {transform_indices = @transform_1, window_bounds = array<i64: 8, 128>}]} {
    %c0_i32 = arith.constant 0 : i32
    %c8_i32 = arith.constant 8 : i32
    %0 = arith.muli %c0_i32, %c8_i32 : i32
    %1 = tpu.assume_multiple %0, 8 : i32
    %2 = arith.index_cast %1 : i32 to index
    %c0 = arith.constant 0 : index
    %3 = vector.load %arg2[%2, %c0] : memref<8x128xi32, #tpu.memory_space<vmem>>, vector<8x128xi32>
    %c2_i32 = arith.constant 2 : i32
    %4 = vector.broadcast %c2_i32 : i32 to vector<8x128xi32>
    %c0_i32_0 = arith.constant 0 : i32
    %5 = arith.index_cast %c0_i32_0 : i32 to index
    %6 = memref.load %arg1[%5] : memref<32xi32, #tpu.memory_space<smem>>
    %7 = vector.broadcast %6 : i32 to vector<8x128xi32>
    %8 = arith.cmpi eq, %3, %7 : vector<8x128xi32>
    %9 = vector.broadcast %c0_i32_0 : i32 to vector<8x128xi32>
    %10 = arith.select %8, %9, %4 : vector<8x128xi1>, vector<8x128xi32>
    %c1_i32 = arith.constant 1 : i32
    %11 = arith.index_cast %c1_i32 : i32 to index
    %12 = memref.load %arg1[%11] : memref<32xi32, #tpu.memory_space<smem>>
    %13 = vector.broadcast %12 : i32 to vector<8x128xi32>
    %14 = arith.cmpi eq, %3, %13 : vector<8x128xi32>
    %15 = vector.broadcast %c1_i32 : i32 to vector<8x128xi32>
    %16 = arith.select %14, %15, %10 : vector<8x128xi1>, vector<8x128xi32>
    %c2_i32_1 = arith.constant 2 : i32
    %17 = arith.index_cast %c2_i32_1 : i32 to index
    %18 = memref.load %arg1[%17] : memref<32xi32, #tpu.memory_space<smem>>
    %19 = vector.broadcast %18 : i32 to vector<8x128xi32>
    %20 = arith.cmpi eq, %3, %19 : vector<8x128xi32>
    %21 = vector.broadcast %c2_i32_1 : i32 to vector<8x128xi32>
    %22 = arith.select %20, %21, %16 : vector<8x128xi1>, vector<8x128xi32>
    %c3_i32 = arith.constant 3 : i32
    %23 = arith.index_cast %c3_i32 : i32 to index
    %24 = memref.load %arg1[%23] : memref<32xi32, #tpu.memory_space<smem>>
    %25 = vector.broadcast %24 : i32 to vector<8x128xi32>
    %26 = arith.cmpi eq, %3, %25 : vector<8x128xi32>
    %27 = vector.broadcast %c3_i32 : i32 to vector<8x128xi32>
    %28 = arith.select %26, %27, %22 : vector<8x128xi1>, vector<8x128xi32>
    %c4_i32 = arith.constant 4 : i32
    %29 = arith.index_cast %c4_i32 : i32 to index
    %30 = memref.load %arg1[%29] : memref<32xi32, #tpu.memory_space<smem>>
    %31 = vector.broadcast %30 : i32 to vector<8x128xi32>
    %32 = arith.cmpi eq, %3, %31 : vector<8x128xi32>
    %33 = vector.broadcast %c4_i32 : i32 to vector<8x128xi32>
    %34 = arith.select %32, %33, %28 : vector<8x128xi1>, vector<8x128xi32>
    %c5_i32 = arith.constant 5 : i32
    %35 = arith.index_cast %c5_i32 : i32 to index
    %36 = memref.load %arg1[%35] : memref<32xi32, #tpu.memory_space<smem>>
    %37 = vector.broadcast %36 : i32 to vector<8x128xi32>
    %38 = arith.cmpi eq, %3, %37 : vector<8x128xi32>
    %39 = vector.broadcast %c5_i32 : i32 to vector<8x128xi32>
    %40 = arith.select %38, %39, %34 : vector<8x128xi1>, vector<8x128xi32>
    %c6_i32 = arith.constant 6 : i32
    %41 = arith.index_cast %c6_i32 : i32 to index
    %42 = memref.load %arg1[%41] : memref<32xi32, #tpu.memory_space<smem>>
    %43 = vector.broadcast %42 : i32 to vector<8x128xi32>
    %44 = arith.cmpi eq, %3, %43 : vector<8x128xi32>
    %45 = vector.broadcast %c6_i32 : i32 to vector<8x128xi32>
    %46 = arith.select %44, %45, %40 : vector<8x128xi1>, vector<8x128xi32>
    %c7_i32 = arith.constant 7 : i32
    %47 = arith.index_cast %c7_i32 : i32 to index
    %48 = memref.load %arg1[%47] : memref<32xi32, #tpu.memory_space<smem>>
    %49 = vector.broadcast %48 : i32 to vector<8x128xi32>
    %50 = arith.cmpi eq, %3, %49 : vector<8x128xi32>
    %51 = vector.broadcast %c7_i32 : i32 to vector<8x128xi32>
    %52 = arith.select %50, %51, %46 : vector<8x128xi1>, vector<8x128xi32>
    %c8_i32_2 = arith.constant 8 : i32
    %53 = arith.index_cast %c8_i32_2 : i32 to index
    %54 = memref.load %arg1[%53] : memref<32xi32, #tpu.memory_space<smem>>
    %55 = vector.broadcast %54 : i32 to vector<8x128xi32>
    %56 = arith.cmpi eq, %3, %55 : vector<8x128xi32>
    %57 = vector.broadcast %c8_i32_2 : i32 to vector<8x128xi32>
    %58 = arith.select %56, %57, %52 : vector<8x128xi1>, vector<8x128xi32>
    %c9_i32 = arith.constant 9 : i32
    %59 = arith.index_cast %c9_i32 : i32 to index
    %60 = memref.load %arg1[%59] : memref<32xi32, #tpu.memory_space<smem>>
    %61 = vector.broadcast %60 : i32 to vector<8x128xi32>
    %62 = arith.cmpi eq, %3, %61 : vector<8x128xi32>
    %63 = vector.broadcast %c9_i32 : i32 to vector<8x128xi32>
    %64 = arith.select %62, %63, %58 : vector<8x128xi1>, vector<8x128xi32>
    %c10_i32 = arith.constant 10 : i32
    %65 = arith.index_cast %c10_i32 : i32 to index
    %66 = memref.load %arg1[%65] : memref<32xi32, #tpu.memory_space<smem>>
    %67 = vector.broadcast %66 : i32 to vector<8x128xi32>
    %68 = arith.cmpi eq, %3, %67 : vector<8x128xi32>
    %69 = vector.broadcast %c10_i32 : i32 to vector<8x128xi32>
    %70 = arith.select %68, %69, %64 : vector<8x128xi1>, vector<8x128xi32>
    %c11_i32 = arith.constant 11 : i32
    %71 = arith.index_cast %c11_i32 : i32 to index
    %72 = memref.load %arg1[%71] : memref<32xi32, #tpu.memory_space<smem>>
    %73 = vector.broadcast %72 : i32 to vector<8x128xi32>
    %74 = arith.cmpi eq, %3, %73 : vector<8x128xi32>
    %75 = vector.broadcast %c11_i32 : i32 to vector<8x128xi32>
    %76 = arith.select %74, %75, %70 : vector<8x128xi1>, vector<8x128xi32>
    %c12_i32 = arith.constant 12 : i32
    %77 = arith.index_cast %c12_i32 : i32 to index
    %78 = memref.load %arg1[%77] : memref<32xi32, #tpu.memory_space<smem>>
    %79 = vector.broadcast %78 : i32 to vector<8x128xi32>
    %80 = arith.cmpi eq, %3, %79 : vector<8x128xi32>
    %81 = vector.broadcast %c12_i32 : i32 to vector<8x128xi32>
    %82 = arith.select %80, %81, %76 : vector<8x128xi1>, vector<8x128xi32>
    %c13_i32 = arith.constant 13 : i32
    %83 = arith.index_cast %c13_i32 : i32 to index
    %84 = memref.load %arg1[%83] : memref<32xi32, #tpu.memory_space<smem>>
    %85 = vector.broadcast %84 : i32 to vector<8x128xi32>
    %86 = arith.cmpi eq, %3, %85 : vector<8x128xi32>
    %87 = vector.broadcast %c13_i32 : i32 to vector<8x128xi32>
    %88 = arith.select %86, %87, %82 : vector<8x128xi1>, vector<8x128xi32>
    %c14_i32 = arith.constant 14 : i32
    %89 = arith.index_cast %c14_i32 : i32 to index
    %90 = memref.load %arg1[%89] : memref<32xi32, #tpu.memory_space<smem>>
    %91 = vector.broadcast %90 : i32 to vector<8x128xi32>
    %92 = arith.cmpi eq, %3, %91 : vector<8x128xi32>
    %93 = vector.broadcast %c14_i32 : i32 to vector<8x128xi32>
    %94 = arith.select %92, %93, %88 : vector<8x128xi1>, vector<8x128xi32>
    %c15_i32 = arith.constant 15 : i32
    %95 = arith.index_cast %c15_i32 : i32 to index
    %96 = memref.load %arg1[%95] : memref<32xi32, #tpu.memory_space<smem>>
    %97 = vector.broadcast %96 : i32 to vector<8x128xi32>
    %98 = arith.cmpi eq, %3, %97 : vector<8x128xi32>
    %99 = vector.broadcast %c15_i32 : i32 to vector<8x128xi32>
    %100 = arith.select %98, %99, %94 : vector<8x128xi1>, vector<8x128xi32>
    %c16_i32 = arith.constant 16 : i32
    %101 = arith.index_cast %c16_i32 : i32 to index
    %102 = memref.load %arg1[%101] : memref<32xi32, #tpu.memory_space<smem>>
    %103 = vector.broadcast %102 : i32 to vector<8x128xi32>
    %104 = arith.cmpi eq, %3, %103 : vector<8x128xi32>
    %105 = vector.broadcast %c16_i32 : i32 to vector<8x128xi32>
    %106 = arith.select %104, %105, %100 : vector<8x128xi1>, vector<8x128xi32>
    %c17_i32 = arith.constant 17 : i32
    %107 = arith.index_cast %c17_i32 : i32 to index
    %108 = memref.load %arg1[%107] : memref<32xi32, #tpu.memory_space<smem>>
    %109 = vector.broadcast %108 : i32 to vector<8x128xi32>
    %110 = arith.cmpi eq, %3, %109 : vector<8x128xi32>
    %111 = vector.broadcast %c17_i32 : i32 to vector<8x128xi32>
    %112 = arith.select %110, %111, %106 : vector<8x128xi1>, vector<8x128xi32>
    %c18_i32 = arith.constant 18 : i32
    %113 = arith.index_cast %c18_i32 : i32 to index
    %114 = memref.load %arg1[%113] : memref<32xi32, #tpu.memory_space<smem>>
    %115 = vector.broadcast %114 : i32 to vector<8x128xi32>
    %116 = arith.cmpi eq, %3, %115 : vector<8x128xi32>
    %117 = vector.broadcast %c18_i32 : i32 to vector<8x128xi32>
    %118 = arith.select %116, %117, %112 : vector<8x128xi1>, vector<8x128xi32>
    %c19_i32 = arith.constant 19 : i32
    %119 = arith.index_cast %c19_i32 : i32 to index
    %120 = memref.load %arg1[%119] : memref<32xi32, #tpu.memory_space<smem>>
    %121 = vector.broadcast %120 : i32 to vector<8x128xi32>
    %122 = arith.cmpi eq, %3, %121 : vector<8x128xi32>
    %123 = vector.broadcast %c19_i32 : i32 to vector<8x128xi32>
    %124 = arith.select %122, %123, %118 : vector<8x128xi1>, vector<8x128xi32>
    %c20_i32 = arith.constant 20 : i32
    %125 = arith.index_cast %c20_i32 : i32 to index
    %126 = memref.load %arg1[%125] : memref<32xi32, #tpu.memory_space<smem>>
    %127 = vector.broadcast %126 : i32 to vector<8x128xi32>
    %128 = arith.cmpi eq, %3, %127 : vector<8x128xi32>
    %129 = vector.broadcast %c20_i32 : i32 to vector<8x128xi32>
    %130 = arith.select %128, %129, %124 : vector<8x128xi1>, vector<8x128xi32>
    %c21_i32 = arith.constant 21 : i32
    %131 = arith.index_cast %c21_i32 : i32 to index
    %132 = memref.load %arg1[%131] : memref<32xi32, #tpu.memory_space<smem>>
    %133 = vector.broadcast %132 : i32 to vector<8x128xi32>
    %134 = arith.cmpi eq, %3, %133 : vector<8x128xi32>
    %135 = vector.broadcast %c21_i32 : i32 to vector<8x128xi32>
    %136 = arith.select %134, %135, %130 : vector<8x128xi1>, vector<8x128xi32>
    %c22_i32 = arith.constant 22 : i32
    %137 = arith.index_cast %c22_i32 : i32 to index
    %138 = memref.load %arg1[%137] : memref<32xi32, #tpu.memory_space<smem>>
    %139 = vector.broadcast %138 : i32 to vector<8x128xi32>
    %140 = arith.cmpi eq, %3, %139 : vector<8x128xi32>
    %141 = vector.broadcast %c22_i32 : i32 to vector<8x128xi32>
    %142 = arith.select %140, %141, %136 : vector<8x128xi1>, vector<8x128xi32>
    %c23_i32 = arith.constant 23 : i32
    %143 = arith.index_cast %c23_i32 : i32 to index
    %144 = memref.load %arg1[%143] : memref<32xi32, #tpu.memory_space<smem>>
    %145 = vector.broadcast %144 : i32 to vector<8x128xi32>
    %146 = arith.cmpi eq, %3, %145 : vector<8x128xi32>
    %147 = vector.broadcast %c23_i32 : i32 to vector<8x128xi32>
    %148 = arith.select %146, %147, %142 : vector<8x128xi1>, vector<8x128xi32>
    %c24_i32 = arith.constant 24 : i32
    %149 = arith.index_cast %c24_i32 : i32 to index
    %150 = memref.load %arg1[%149] : memref<32xi32, #tpu.memory_space<smem>>
    %151 = vector.broadcast %150 : i32 to vector<8x128xi32>
    %152 = arith.cmpi eq, %3, %151 : vector<8x128xi32>
    %153 = vector.broadcast %c24_i32 : i32 to vector<8x128xi32>
    %154 = arith.select %152, %153, %148 : vector<8x128xi1>, vector<8x128xi32>
    %c25_i32 = arith.constant 25 : i32
    %155 = arith.index_cast %c25_i32 : i32 to index
    %156 = memref.load %arg1[%155] : memref<32xi32, #tpu.memory_space<smem>>
    %157 = vector.broadcast %156 : i32 to vector<8x128xi32>
    %158 = arith.cmpi eq, %3, %157 : vector<8x128xi32>
    %159 = vector.broadcast %c25_i32 : i32 to vector<8x128xi32>
    %160 = arith.select %158, %159, %154 : vector<8x128xi1>, vector<8x128xi32>
    %c26_i32 = arith.constant 26 : i32
    %161 = arith.index_cast %c26_i32 : i32 to index
    %162 = memref.load %arg1[%161] : memref<32xi32, #tpu.memory_space<smem>>
    %163 = vector.broadcast %162 : i32 to vector<8x128xi32>
    %164 = arith.cmpi eq, %3, %163 : vector<8x128xi32>
    %165 = vector.broadcast %c26_i32 : i32 to vector<8x128xi32>
    %166 = arith.select %164, %165, %160 : vector<8x128xi1>, vector<8x128xi32>
    %c27_i32 = arith.constant 27 : i32
    %167 = arith.index_cast %c27_i32 : i32 to index
    %168 = memref.load %arg1[%167] : memref<32xi32, #tpu.memory_space<smem>>
    %169 = vector.broadcast %168 : i32 to vector<8x128xi32>
    %170 = arith.cmpi eq, %3, %169 : vector<8x128xi32>
    %171 = vector.broadcast %c27_i32 : i32 to vector<8x128xi32>
    %172 = arith.select %170, %171, %166 : vector<8x128xi1>, vector<8x128xi32>
    %c28_i32 = arith.constant 28 : i32
    %173 = arith.index_cast %c28_i32 : i32 to index
    %174 = memref.load %arg1[%173] : memref<32xi32, #tpu.memory_space<smem>>
    %175 = vector.broadcast %174 : i32 to vector<8x128xi32>
    %176 = arith.cmpi eq, %3, %175 : vector<8x128xi32>
    %177 = vector.broadcast %c28_i32 : i32 to vector<8x128xi32>
    %178 = arith.select %176, %177, %172 : vector<8x128xi1>, vector<8x128xi32>
    %c29_i32 = arith.constant 29 : i32
    %179 = arith.index_cast %c29_i32 : i32 to index
    %180 = memref.load %arg1[%179] : memref<32xi32, #tpu.memory_space<smem>>
    %181 = vector.broadcast %180 : i32 to vector<8x128xi32>
    %182 = arith.cmpi eq, %3, %181 : vector<8x128xi32>
    %183 = vector.broadcast %c29_i32 : i32 to vector<8x128xi32>
    %184 = arith.select %182, %183, %178 : vector<8x128xi1>, vector<8x128xi32>
    %c30_i32 = arith.constant 30 : i32
    %185 = arith.index_cast %c30_i32 : i32 to index
    %186 = memref.load %arg1[%185] : memref<32xi32, #tpu.memory_space<smem>>
    %187 = vector.broadcast %186 : i32 to vector<8x128xi32>
    %188 = arith.cmpi eq, %3, %187 : vector<8x128xi32>
    %189 = vector.broadcast %c30_i32 : i32 to vector<8x128xi32>
    %190 = arith.select %188, %189, %184 : vector<8x128xi1>, vector<8x128xi32>
    %c31_i32 = arith.constant 31 : i32
    %191 = arith.index_cast %c31_i32 : i32 to index
    %192 = memref.load %arg1[%191] : memref<32xi32, #tpu.memory_space<smem>>
    %193 = vector.broadcast %192 : i32 to vector<8x128xi32>
    %194 = arith.cmpi eq, %3, %193 : vector<8x128xi32>
    %195 = vector.broadcast %c31_i32 : i32 to vector<8x128xi32>
    %196 = arith.select %194, %195, %190 : vector<8x128xi1>, vector<8x128xi32>
    %c32_i32 = arith.constant 32 : i32
    %197 = arith.index_cast %1 : i32 to index
    %c0_3 = arith.constant 0 : index
    %198 = vector.load %arg3[%197, %c0_3] : memref<8x128xi32, #tpu.memory_space<vmem>>, vector<8x128xi32>
    tpu.vector_store %arg3[%197, %c0_3], %196 {strides = array<i32>} : memref<8x128xi32, #tpu.memory_space<vmem>>, vector<8x128xi32>,
    %c1_i32_4 = arith.constant 1 : i32
    return
  }
  func.func @transform_0(%arg0: i32, %arg1: memref<32xi32, #tpu.memory_space<smem>>) -> (i32, i32) {
    %c0_i32 = arith.constant 0 : i32
    %c0_i32_0 = arith.constant 0 : i32
    return %arg0, %c0_i32 : i32, i32
  }
  func.func @transform_1(%arg0: i32, %arg1: memref<32xi32, #tpu.memory_space<smem>>) -> (i32, i32) {
    %c0_i32 = arith.constant 0 : i32
    %c0_i32_0 = arith.constant 0 : i32
    return %arg0, %c0_i32 : i32, i32
  }
}

</mosaic_0001>

<bundles_post_ra>
// kernel: tpu_custom_call.1
= control target key start
LH: loop header
LB: loop body
LE: loop exit
PB: predicated region body
PF: predicated region fallthrough
CT: control target
= control target key end

     0   :  { %s260_s9 = smov [#allocation3]   ;;  %s322_s0 = inlined_call_operand.hbm [shape: s32[32], index: 0, kind: input, shape index: {}]   ;;  %s323_s1 = inlined_call_operand.hbm [shape: s32[8,128], index: 1, kind: input, shape index: {}]   ;;  %s324_s2 = inlined_call_operand.hbm [shape: s32[8,128], index: 2, kind: output, shape index: {}]  }
   0x1   :  { %8 = dma.hbm_to_smem %s322_s0, 16, %s260_s9, [#allocation2] }
   0x2   :  { %254 = dma.done.wait [#allocation2], 16 }
   0x3   :  { %255 = vsyncadd [#allocation2], 4294967280 }
   0x4   :  { %10 = sfence }
   0x5   :  { %11 = vsyncpa [#allocation5], 0 }
   0x6   :  { %12 = vsyncpa [#allocation6], 0  ;;  %s261_s12 = smov [#allocation4]  }
   0x7   :  { %s19_s13 = sshll.u32 %s261_s12, 4  ;;  %s20_s13 = int_to_ptr.vmem [resolvable:$true] %s19_s13 }
   0x8   :  { %s222_s14 = scalar_lea.vmem %s20_s13, 128  ;;  %p227_p1 = scmp.lt.s32.totalorder %s20_s13, %s20_s13 }
   0x9   :  { %p223_p0 = scmp.ne.s32.totalorder %s20_s13, %s222_s14  ;;  %p228_p2 = scmp.lt.s32.totalorder %s222_s14, %s222_s14 }
   0xb   :  { %p229_p3 = por %p228_p2, %p227_p1 }
   0xd   :  { %p230_p4 = pnand %p229_p3, %p223_p0 }
   0xf   :  { %233 = shalt.err (!%p230_p4)
}
  0x10   :  { %22 = dma.hbm_to_vmem [thread:$0]  %s323_s1, 128, %s20_s13, [#allocation5]  }
  0x11   :  { %256 = dma.done.wait [#allocation5], 128  }
  0x12   :  { %257 = vsyncadd [#allocation5], 4294967168  ;;  %s27_s0 = sld [smem:[#allocation3]]  ;;  %v285_v0 = vld [vmem:[#allocation4] sm:$0xff]  ;;  %v262_v3 = vmov 2  }
  0x13   :  { %s171_s17 = sld [smem:[#allocation3 + $0x1]] }
  0x14   :  { %s172_s18 = sld [smem:[#allocation3 + $0x2]] }
  0x15   :  { %s173_s19 = sld [smem:[#allocation3 + $0x3]] }
  0x16   :  { %s174_s20 = sld [smem:[#allocation3 + $0x4]] }
  0x17   :  { %s175_s21 = sld [smem:[#allocation3 + $0x5]] }
  0x18   :  { %v28_v1 = vstv %s27_s0  ;;  %s176_s22 = sld [smem:[#allocation3 + $0x6]] }
  0x19   :  { %vm29_vm0 = vcmp.eq.s32.totalorder %v285_v0, %v28_v1  ;;  %v32_v2 = vstv %s171_s17  ;;  %s177_s23 = sld [smem:[#allocation3 + $0x7]] }
  0x1a   :  { %v30_v4 = vsel %vm29_vm0, 0, %v262_v3  ;;  %vm33_vm1 = vcmp.eq.s32.totalorder %v285_v0, %v32_v2  ;;  %v36_v5 = vstv %s172_s18  ;;  %s178_s1 = sld [smem:[#allocation3 + $0x8]]  ;;  %s263_s18 = smov [#allocation7]  }
  0x1b   :  { %v34_v6 = vsel %vm33_vm1, 1, %v30_v4  ;;  %vm37_vm2 = vcmp.eq.s32.totalorder %v285_v0, %v36_v5  ;;  %v40_v7 = vstv %s173_s19  ;;  %s179_s24 = sld [smem:[#allocation3 + $0x9]]  ;;  %s162_s19 = sshll.u32 %s263_s18, 4  ;;  %s163_s19 = int_to_ptr.vmem [resolvable:$true] %s162_s19 }
  0x1c   :  { %v38_v8 = vsel %vm37_vm2, 2, %v34_v6  ;;  %vm41_vm3 = vcmp.eq.s32.totalorder %v285_v0, %v40_v7  ;;  %v44_v9 = vstv %s174_s20  ;;  %s180_s25 = sld [smem:[#allocation3 + $0xa]]  ;;  %s234_s20 = scalar_lea.vmem %s163_s19, 128 }
  0x1d   :  { %v42_v10 = vsel %vm41_vm3, 3, %v38_v8  ;;  %vm45_vm4 = vcmp.eq.s32.totalorder %v285_v0, %v44_v9  ;;  %v48_v11 = vstv %s175_s21  ;;  %s181_s26 = sld [smem:[#allocation3 + $0xb]]  ;;  %p235_p5 = scmp.ne.s32.totalorder %s163_s19, %s234_s20 }
  0x1e   :  { %v46_v12 = vsel %vm45_vm4, 4, %v42_v10  ;;  %vm49_vm5 = vcmp.eq.s32.totalorder %v285_v0, %v48_v11  ;;  %v52_v13 = vstv %s176_s22  ;;  %s182_s27 = sld [smem:[#allocation3 + $0xc]]  ;;  %p239_p6 = scmp.lt.s32.totalorder %s163_s19, %s163_s19 }
  0x1f   :  { %v50_v14 = vsel %vm49_vm5, 5, %v46_v12  ;;  %vm53_vm6 = vcmp.eq.s32.totalorder %v285_v0, %v52_v13  ;;  %v56_v15 = vstv %s177_s23  ;;  %s183_s28 = sld [smem:[#allocation3 + $0xd]]  ;;  %p240_p7 = scmp.lt.s32.totalorder %s234_s20, %s234_s20 }
  0x20   :  { %v54_v16 = vsel %vm53_vm6, 6, %v50_v14  ;;  %vm57_vm7 = vcmp.eq.s32.totalorder %v285_v0, %v56_v15  ;;  %v60_v17 = vstv %s178_s1  ;;  %s184_s29 = sld [smem:[#allocation3 + $0xe]] }
  0x21   :  { %v58_v18 = vsel %vm57_vm7, 7, %v54_v16  ;;  %vm61_vm8 = vcmp.eq.s32.totalorder %v285_v0, %v60_v17  ;;  %v64_v19 = vstv %s179_s24  ;;  %s185_s30 = sld [smem:[#allocation3 + $0xf]]  ;;  %p241_p8 = por %p240_p7, %p239_p6 }
  0x22   :  { %v62_v20 = vsel %vm61_vm8, 8, %v58_v18  ;;  %vm65_vm9 = vcmp.eq.s32.totalorder %v285_v0, %v64_v19  ;;  %v68_v21 = vstv %s180_s25  ;;  %s186_s3 = sld [smem:[#allocation3 + $0x10]] }
  0x23   :  { %v66_v22 = vsel %vm65_vm9, 9, %v62_v20  ;;  %vm69_vm10 = vcmp.eq.s32.totalorder %v285_v0, %v68_v21  ;;  %v72_v23 = vstv %s181_s26  ;;  %s187_s4 = sld [smem:[#allocation3 + $0x11]]  ;;  %p242_p9 = pnand %p241_p8, %p235_p5 }
  0x24   :  { %v70_v24 = vsel %vm69_vm10, 10, %v66_v22  ;;  %vm73_vm11 = vcmp.eq.s32.totalorder %v285_v0, %v72_v23  ;;  %v76_v25 = vstv %s182_s27  ;;  %s188_s5 = sld [smem:[#allocation3 + $0x12]] }
  0x25   :  { %v74_v26 = vsel %vm73_vm11, 11, %v70_v24  ;;  %vm77_vm12 = vcmp.eq.s32.totalorder %v285_v0, %v76_v25  ;;  %v80_v27 = vstv %s183_s28  ;;  %s189_s6 = sld [smem:[#allocation3 + $0x13]] }
  0x26   :  { %v78_v28 = vsel %vm77_vm12, 12, %v74_v26  ;;  %vm81_vm13 = vcmp.eq.s32.totalorder %v285_v0, %v80_v27  ;;  %v84_v29 = vstv %s184_s29  ;;  %s190_s7 = sld [smem:[#allocation3 + $0x14]] }
  0x27   :  { %v82_v30 = vsel %vm81_vm13, 13, %v78_v28  ;;  %vm85_vm14 = vcmp.eq.s32.totalorder %v285_v0, %v84_v29  ;;  %v88_v31 = vstv %s185_s30  ;;  %s191_s8 = sld [smem:[#allocation3 + $0x15]] }
  0x28   :  { %v86_v32 = vsel %vm85_vm14, 14, %v82_v30  ;;  %vm89_vm15 = vcmp.eq.s32.totalorder %v285_v0, %v88_v31  ;;  %v92_v33 = vstv %s186_s3  ;;  %s192_s9 = sld [smem:[#allocation3 + $0x16]] }
  0x29   :  { %v90_v34 = vsel %vm89_vm15, 15, %v86_v32  ;;  %vm93_vm0 = vcmp.eq.s32.totalorder %v285_v0, %v92_v33  ;;  %v96_v35 = vstv %s187_s4  ;;  %s193_s10 = sld [smem:[#allocation3 + $0x17]] }
  0x2a   :  { %v94_v36 = vsel %vm93_vm0, 16, %v90_v34  ;;  %vm97_vm1 = vcmp.eq.s32.totalorder %v285_v0, %v96_v35  ;;  %v100_v37 = vstv %s188_s5  ;;  %s194_s11 = sld [smem:[#allocation3 + $0x18]] }
  0x2b   :  { %v98_v38 = vsel %vm97_vm1, 17, %v94_v36  ;;  %vm101_vm2 = vcmp.eq.s32.totalorder %v285_v0, %v100_v37  ;;  %v104_v39 = vstv %s189_s6  ;;  %s195_s12 = sld [smem:[#allocation3 + $0x19]] }
  0x2c   :  { %v102_v40 = vsel %vm101_vm2, 18, %v98_v38  ;;  %vm105_vm3 = vcmp.eq.s32.totalorder %v285_v0, %v104_v39  ;;  %v108_v41 = vstv %s190_s7  ;;  %s196_s13 = sld [smem:[#allocation3 + $0x1a]] }
  0x2d   :  { %v106_v42 = vsel %vm105_vm3, 19, %v102_v40  ;;  %vm109_vm4 = vcmp.eq.s32.totalorder %v285_v0, %v108_v41  ;;  %v112_v43 = vstv %s191_s8  ;;  %s197_s14 = sld [smem:[#allocation3 + $0x1b]] }
  0x2e   :  { %v110_v44 = vsel %vm109_vm4, 20, %v106_v42  ;;  %vm113_vm5 = vcmp.eq.s32.totalorder %v285_v0, %v112_v43  ;;  %v116_v45 = vstv %s192_s9  ;;  %s198_s15 = sld [smem:[#allocation3 + $0x1c]] }
  0x2f   :  { %v114_v46 = vsel %vm113_vm5, 21, %v110_v44  ;;  %vm117_vm6 = vcmp.eq.s32.totalorder %v285_v0, %v116_v45  ;;  %v120_v47 = vstv %s193_s10  ;;  %s199_s16 = sld [smem:[#allocation3 + $0x1d]] }
  0x30   :  { %v118_v48 = vsel %vm117_vm6, 22, %v114_v46  ;;  %vm121_vm7 = vcmp.eq.s32.totalorder %v285_v0, %v120_v47  ;;  %v124_v49 = vstv %s194_s11  ;;  %s200_s0 = sld [smem:[#allocation3 + $0x1e]] }
  0x31   :  { %v122_v50 = vsel %vm121_vm7, 23, %v118_v48  ;;  %vm125_vm8 = vcmp.eq.s32.totalorder %v285_v0, %v124_v49  ;;  %v128_v51 = vstv %s195_s12  ;;  %s201_s17 = sld [smem:[#allocation3 + $0x1f]] }
  0x32   :  { %v126_v52 = vsel %vm125_vm8, 24, %v122_v50  ;;  %vm129_vm9 = vcmp.eq.s32.totalorder %v285_v0, %v128_v51  ;;  %v132_v53 = vstv %s196_s13 }
  0x33   :  { %v130_v54 = vsel %vm129_vm9, 25, %v126_v52  ;;  %vm133_vm10 = vcmp.eq.s32.totalorder %v285_v0, %v132_v53  ;;  %v136_v55 = vstv %s197_s14 }
  0x34   :  { %v134_v56 = vsel %vm133_vm10, 26, %v130_v54  ;;  %vm137_vm11 = vcmp.eq.s32.totalorder %v285_v0, %v136_v55  ;;  %v140_v57 = vstv %s198_s15 }
  0x35   :  { %v138_v58 = vsel %vm137_vm11, 27, %v134_v56  ;;  %vm141_vm12 = vcmp.eq.s32.totalorder %v285_v0, %v140_v57  ;;  %v144_v59 = vstv %s199_s16 }
  0x36   :  { %v142_v60 = vsel %vm141_vm12, 28, %v138_v58  ;;  %vm145_vm13 = vcmp.eq.s32.totalorder %v285_v0, %v144_v59  ;;  %v148_v61 = vstv %s200_s0 }
  0x37   :  { %v146_v62 = vsel %vm145_vm13, 29, %v142_v60  ;;  %vm149_vm14 = vcmp.eq.s32.totalorder %v285_v0, %v148_v61  ;;  %v152_v63 = vstv %s201_s17 }
  0x38   :  { %v150_v1 = vsel %vm149_vm14, 30, %v146_v62  ;;  %vm153_vm15 = vcmp.eq.s32.totalorder %v285_v0, %v152_v63 }
  0x39   :  { %v154_v2 = vsel %vm153_vm15, 31, %v150_v1 }
  0x3a   :  { %155 = vst [vmem:[#allocation7] sm:$0xff] %v154_v2 }
  0x3b   :  { %245 = shalt.err (!%p242_p9)
}
  0x3c   :  { %165 = dma.vmem_to_hbm [thread:$0]  %s163_s19, 128, %s324_s2, [#allocation6]  }
  0x3d   :  { %258 = dma.done.wait [#allocation6], 128  }
  0x3e   :  { %259 = vsyncadd [#allocation6], 4294967168 }
  0x3f   :  { %169 = vsyncpa [#allocation5], 1 }
  0x40   :  { %170 = vsyncpa [#allocation6], 1 }

</bundles_post_ra>
